<compile_context>
chip_gen: v6e
topology: v6e:2x2x1
jax: 0.10.0
libtpu: 0.0.40
codegen_flags: <defaults>
</compile_context>

<pallas_src>
import functools

import jax
import jax.numpy as jnp
from jax.experimental import pallas as pl
from jax.experimental.pallas import tpu as pltpu

_LANE = 128
_MAX_TILE_D = 128 * _LANE   # cap per-step column width (bounds unrolled chunk adds)


def _round_up(x, m):
    return ((x + m - 1) // m) * m


def _tpu_vmem_bytes(default=64 * 1024 * 1024):
    """Physical VMEM per TensorCore (best effort; conservative v7x default)."""
    try:
        info = pltpu.get_tpu_info()
        for attr in ("vmem_capacity_bytes", "vmem_bytes", "vmem_capacity"):
            v = getattr(info, attr, None)
            if v:
                return int(v)
    except Exception:
        pass
    return default


def _num_tensorcores():
    """Best-effort TensorCores-per-device (megacore parts report 2)."""
    try:
        info = pltpu.get_tpu_info()
        for attr in ("num_cores", "core_count", "num_tensorcores"):
            v = getattr(info, attr, None)
            if v:
                return int(v)
    except Exception:
        pass
    try:
        kind = jax.devices()[0].device_kind.lower()
        if any(tag in kind for tag in ("v4", "v5p", "v7", "7x")):
            return 2
    except Exception:
        pass
    return 1


def _per_sample_mse_kernel(x_ref, t_ref, o_ref, acc_ref, *, inv_d, true_d,
                           tile_d, n_chunks, mask_tail, mxu_finalize):
    """Accumulate sum((x - t)^2) over the D (reduction, last) grid axis."""
    k = pl.program_id(1)

    @pl.when(k == 0)
    def _():
        acc_ref[...] = jnp.zeros_like(acc_ref)

    diff = x_ref[...].astype(jnp.float32) - t_ref[...].astype(jnp.float32)

    if mask_tail:
        # Zero the out-of-bounds tail columns of the ragged last D tile (the
        # DMA'd data there is garbage).  The predicate is uniformly true for
        # all earlier tiles, so applying it unconditionally is correct and its
        # per-step VPU cost is negligible in a DMA-bound kernel.
        col = jax.lax.broadcasted_iota(jnp.int32, diff.shape, dimension=1)
        diff = jnp.where(col + k * tile_d < true_d, diff, 0.0)

    sq = diff * diff

    # Fold 128-wide column chunks into the lane-resident accumulator with a
    # pairwise tree of pure VPU adds; no XLU work on the per-step hot path.
    if n_chunks == 1:
        partial = sq
    else:
        chunks = [sq[:, c * _LANE:(c + 1) * _LANE] for c in range(n_chunks)]
        while len(chunks) > 1:
            nxt = [chunks[i] + chunks[i + 1]
                   for i in range(0, len(chunks) - 1, 2)]
            if len(chunks) % 2:
                nxt.append(chunks[-1])
            chunks = nxt
        partial = chunks[0]
    acc_ref[...] += partial

    @pl.when(k == pl.num_programs(1) - 1)
    def _():
        acc = acc_ref[...]
        if mxu_finalize:
            # Large batch tile: do the final cross-lane reduce on the
            # (otherwise idle) MXU instead of tile_b/8 XLU lane reductions.
            ones = jnp.ones((acc.shape[1], _LANE), jnp.float32)
            row = jnp.dot(acc, ones, preferred_element_type=jnp.float32)[:, :1]
        else:
            row = jnp.sum(acc, axis=1, keepdims=True)
        # Single multiply by the reciprocal of the TRUE feature count.
        o_ref[...] = (row * inv_d).astype(o_ref.dtype)


def per_sample_mse_loss(inp, tgt, *, block_budget_bytes=None):
    """PerSampleMSELoss.forward: mean((input - target)**2, dim=1).

    inp, tgt: (B, D) arrays (f32 / bf16).  Returns a (B,) array in inp.dtype.
    """
    assert inp.shape == tgt.shape and inp.ndim == 2
    assert inp.dtype == tgt.dtype
    B, D = inp.shape

    itemsize = jnp.dtype(inp.dtype).itemsize
    sublane = max(8, 32 // itemsize)      # 8 for f32, 16 for bf16

    vmem_physical = _tpu_vmem_bytes()
    if block_budget_bytes is None:
        # ~1/10 of physical VMEM per input block: 2 inputs x 2 pipeline buffers
        # land around 40% of VMEM (v7x: ~6.4 MiB blocks, v5e/v6e: ~12.8 MiB),
        # big enough to amortize the ~0.35 us per-grid-step overhead.
        block_budget_bytes = min(max(vmem_physical // 10, 2 * 1024 * 1024),
                                 16 * 1024 * 1024)

    # --- tile sizes (blocks never exceed the array extent) -------------------
    if D >= _LANE:
        d_cap = (D // _LANE) * _LANE      # largest 128-multiple <= D
        max_tile_d = max(
            _LANE,
            (block_budget_bytes // (itemsize * sublane)) // _LANE * _LANE)
        tile_d = min(d_cap, max_tile_d, _MAX_TILE_D)
    else:
        tile_d = D                        # tiny feature dim: full-D (sub-vreg) tile
    n_chunks = tile_d // _LANE if tile_d >= _LANE else 1

    if B >= sublane:
        b_cap = (B // sublane) * sublane  # largest sublane-multiple <= B
        tile_b = (block_budget_bytes // (itemsize * tile_d)) // sublane * sublane
        tile_b = max(sublane, min(tile_b, b_cap))
        # Give both TensorCores work on megacore parts; on 1-TC chips splitting
        # only adds a grid step and smaller DMAs, so keep one big batch tile.
        if (_num_tensorcores() >= 2 and pl.cdiv(B, tile_b) == 1
                and B >= 2 * sublane):
            tile_b = min(_round_up((B + 1) // 2, sublane), b_cap)
    else:
        tile_b = B                        # tiny batch: block == full batch dim

    grid = (pl.cdiv(B, tile_b), pl.cdiv(D, tile_d))
    acc_width = _LANE if tile_d >= _LANE else tile_d

    kernel = functools.partial(
        _per_sample_mse_kernel,
        inv_d=1.0 / float(D), true_d=D, tile_d=tile_d, n_chunks=n_chunks,
        mask_tail=(D % tile_d != 0), mxu_finalize=(tile_b >= 512))

    # Scoped-VMEM limit derived from the tiles actually chosen (2 inputs x 2
    # pipeline buffers + accumulator + output buffers) plus headroom, capped at
    # this generation's physical capacity.
    block_bytes = tile_b * tile_d * itemsize
    vmem_limit = (4 * block_bytes + tile_b * acc_width * 4 + 2 * tile_b * 4
                  + 4 * 1024 * 1024)
    vmem_limit = int(min(max(vmem_limit, 16 * 1024 * 1024), vmem_physical))

    out = pl.pallas_call(
        kernel,
        out_shape=jax.ShapeDtypeStruct((B, 1), jnp.float32),
        grid_spec=pltpu.PrefetchScalarGridSpec(
            num_scalar_prefetch=0,
            grid=grid,
            in_specs=[
                pl.BlockSpec((tile_b, tile_d), lambda i, k: (i, k)),
                pl.BlockSpec((tile_b, tile_d), lambda i, k: (i, k)),
            ],
            # Output block stays resident across the reduction (k) axis and is
            # written once at the last k step.  (Lane-dense output packing is
            # deliberately skipped: output traffic is negligible vs. inputs.)
            out_specs=pl.BlockSpec((tile_b, 1), lambda i, k: (i, 0)),
            scratch_shapes=[pltpu.VMEM((tile_b, acc_width), jnp.float32)],
        ),
        compiler_params=pltpu.CompilerParams(
            dimension_semantics=("parallel", "arbitrary"),
            vmem_limit_bytes=vmem_limit,
        ),
    )(inp, tgt)

    return out[:, 0].astype(inp.dtype)


if __name__ == "__main__":
    key = jax.random.PRNGKey(0)
    k1, k2, k3, k4, k5, k6 = jax.random.split(key, 6)

    # 1) Aligned shape, single tile.
    B, D = 8, 256
    inp = jax.random.normal(k1, (B, D), dtype=jnp.float32)
    tgt = jax.random.normal(k2, (B, D), dtype=jnp.float32)
    loss = per_sample_mse_loss(inp, tgt)
    jax.block_until_ready(loss)
    ref = jnp.mean((inp - tgt) ** 2, axis=1)
    assert loss.shape == (B,)
    assert jnp.allclose(loss, ref, atol=1e-5, rtol=1e-5)

    # 2) Unaligned B and D with a small block budget: multi-tile batch and
    #    reduction axes, in-kernel ragged-D lane mask, ragged trailing batch rows.
    B2, D2 = 20, 300
    inp2 = jax.random.normal(k3, (B2, D2), dtype=jnp.float32)
    tgt2 = jax.random.normal(k4, (B2, D2), dtype=jnp.float32)
    loss2 = per_sample_mse_loss(inp2, tgt2, block_budget_bytes=8 * 1024)
    jax.block_until_ready(loss2)
    ref2 = jnp.mean((inp2 - tgt2) ** 2, axis=1)
    assert loss2.shape == (B2,)
    assert jnp.allclose(loss2, ref2, atol=1e-5, rtol=1e-5)

    # 3) Large batch, tiny feature dim: sub-128 full-D tile path plus the MXU
    #    finalize reduce for big batch tiles.
    B3, D3 = 1024, 64
    inp3 = jax.random.normal(k5, (B3, D3), dtype=jnp.float32)
    tgt3 = jax.random.normal(k6, (B3, D3), dtype=jnp.float32)
    loss3 = per_sample_mse_loss(inp3, tgt3)
    jax.block_until_ready(loss3)
    ref3 = jnp.mean((inp3 - tgt3) ** 2, axis=1)
    assert loss3.shape == (B3,)
    assert jnp.allclose(loss3, ref3, atol=1e-5, rtol=1e-5)

    print("KERNEL_OK")
</pallas_src>

<mosaic_0001>
module attributes {stable_mosaic.version = 11 : i64} {
  func.func @_per_sample_mse_kernel(%arg0: i32, %arg1: i32, %arg2: memref<8x256xf32, #tpu.memory_space<vmem>>, %arg3: memref<8x256xf32, #tpu.memory_space<vmem>>, %arg4: memref<8x1xf32, #tpu.memory_space<vmem>>, %arg5: memref<8x128xf32, #tpu.memory_space<vmem>>) attributes {dimension_semantics = [#tpu.dimension_semantics<parallel>, #tpu.dimension_semantics<arbitrary>], iteration_bounds = array<i64: 1, 1>, scalar_prefetch = 0 : i64, scratch_operands = 1 : i64, tpu.core_type = #tpu.core_type<tc>, window_params = [{transform_indices = @transform_0, window_bounds = array<i64: 8, 256>}, {transform_indices = @transform_1, window_bounds = array<i64: 8, 256>}, {transform_indices = @transform_2, window_bounds = array<i64: 8, 1>}]} {
    %c0_i32 = arith.constant 0 : i32
    %0 = arith.cmpi eq, %arg1, %c0_i32 : i32
    %1 = arith.extui %0 : i1 to i32
    %c0_i32_0 = arith.constant 0 : i32
    %2 = arith.cmpi ne, %1, %c0_i32_0 : i32
    scf.if %2 {
      %cst = arith.constant 0.000000e+00 : f32
      %16 = vector.broadcast %cst : f32 to vector<8x128xf32>
      %c0_10 = arith.constant 0 : index
      %c0_11 = arith.constant 0 : index
      %17 = vector.load %arg5[%c0_10, %c0_11] : memref<8x128xf32, #tpu.memory_space<vmem>>, vector<8x128xf32>
      tpu.vector_store %arg5[%c0_10, %c0_11], %16 {strides = array<i32>} : memref<8x128xf32, #tpu.memory_space<vmem>>, vector<8x128xf32>,
    } else {
    }
    %c0 = arith.constant 0 : index
    %c0_1 = arith.constant 0 : index
    %3 = vector.load %arg2[%c0, %c0_1] : memref<8x256xf32, #tpu.memory_space<vmem>>, vector<8x256xf32>
    %c0_2 = arith.constant 0 : index
    %c0_3 = arith.constant 0 : index
    %4 = vector.load %arg3[%c0_2, %c0_3] : memref<8x256xf32, #tpu.memory_space<vmem>>, vector<8x256xf32>
    %5 = arith.subf %3, %4 : vector<8x256xf32>
    %6 = arith.mulf %5, %5 : vector<8x256xf32>
    %7 = vector.extract_strided_slice %6 {offsets = [0, 0], sizes = [8, 128], strides = [1, 1]} : vector<8x256xf32> to vector<8x128xf32>
    %8 = vector.extract_strided_slice %6 {offsets = [0, 128], sizes = [8, 128], strides = [1, 1]} : vector<8x256xf32> to vector<8x128xf32>
    %9 = arith.addf %7, %8 : vector<8x128xf32>
    %c0_4 = arith.constant 0 : index
    %c0_5 = arith.constant 0 : index
    %10 = vector.load %arg5[%c0_4, %c0_5] : memref<8x128xf32, #tpu.memory_space<vmem>>, vector<8x128xf32>
    %11 = arith.addf %10, %9 : vector<8x128xf32>
    %c0_6 = arith.constant 0 : index
    %c0_7 = arith.constant 0 : index
    %12 = vector.load %arg5[%c0_6, %c0_7] : memref<8x128xf32, #tpu.memory_space<vmem>>, vector<8x128xf32>
    tpu.vector_store %arg5[%c0_6, %c0_7], %11 {strides = array<i32>} : memref<8x128xf32, #tpu.memory_space<vmem>>, vector<8x128xf32>,
    %c0_i32_8 = arith.constant 0 : i32
    %13 = arith.cmpi eq, %arg1, %c0_i32_8 : i32
    %14 = arith.extui %13 : i1 to i32
    %c0_i32_9 = arith.constant 0 : i32
    %15 = arith.cmpi ne, %14, %c0_i32_9 : i32
    scf.if %15 {
      %c0_10 = arith.constant 0 : index
      %c0_11 = arith.constant 0 : index
      %16 = vector.load %arg5[%c0_10, %c0_11] : memref<8x128xf32, #tpu.memory_space<vmem>>, vector<8x128xf32>
      %cst = arith.constant dense<0.000000e+00> : vector<8xf32>
      %17 = vector.multi_reduction <add>, %16, %cst [1] : vector<8x128xf32> to vector<8xf32>
      %18 = vector.shape_cast %17 : vector<8xf32> to vector<8x1xf32>
      %cst_12 = arith.constant 3.906250e-03 : f32
      %19 = vector.broadcast %cst_12 : f32 to vector<8x1xf32>
      %20 = arith.mulf %18, %19 : vector<8x1xf32>
      %c0_13 = arith.constant 0 : index
      %c0_14 = arith.constant 0 : index
      %21 = vector.load %arg4[%c0_13, %c0_14] : memref<8x1xf32, #tpu.memory_space<vmem>>, vector<8x1xf32>
      tpu.vector_store %arg4[%c0_13, %c0_14], %20 {strides = array<i32>} : memref<8x1xf32, #tpu.memory_space<vmem>>, vector<8x1xf32>,
    } else {
    }
    return
  }
  func.func @transform_0(%arg0: i32, %arg1: i32) -> (i32, i32) {
    %c0_i32 = arith.constant 0 : i32
    return %arg0, %arg1 : i32, i32
  }
  func.func @transform_1(%arg0: i32, %arg1: i32) -> (i32, i32) {
    %c0_i32 = arith.constant 0 : i32
    return %arg0, %arg1 : i32, i32
  }
  func.func @transform_2(%arg0: i32, %arg1: i32) -> (i32, i32) {
    %c0_i32 = arith.constant 0 : i32
    %c0_i32_0 = arith.constant 0 : i32
    return %arg0, %c0_i32 : i32, i32
  }
}

</mosaic_0001>

<bundles_post_ra>
// kernel: tpu_custom_call.1
= control target key start
LH: loop header
LB: loop body
LE: loop exit
PB: predicated region body
PF: predicated region fallthrough
CT: control target
= control target key end

     0   :  { %7 = vsyncpa [#allocation4], 0  ;;  %s139_s0 = inlined_call_operand.hbm [shape: f32[8,256], index: 0, kind: input, shape index: {}]   ;;  %s140_s1 = inlined_call_operand.hbm [shape: f32[8,256], index: 1, kind: input, shape index: {}]   ;;  %s141_s2 = inlined_call_operand.vmem [shape: f32[8,1], index: 2, kind: output, shape index: {}]  }
   0x1   :  { %8 = vsyncpa [#allocation6], 0  ;;  %s113_s9 = smov [#allocation3]   ;;  %s114_s11 = smov [#allocation5]  }
   0x2   :  { %s15_s10 = sshll.u32 %s113_s9, 4  ;;  %s25_s12 = sshll.u32 %s114_s11, 4  ;;  %s16_s10 = int_to_ptr.vmem [resolvable:$true] %s15_s10  ;;  %s26_s12 = int_to_ptr.vmem [resolvable:$true] %s25_s12 }
   0x3   :  { %s77_s13 = scalar_lea.vmem %s16_s10, 256  ;;  %p82_p1 = scmp.lt.s32.totalorder %s16_s10, %s16_s10 }
   0x4   :  { %p78_p0 = scmp.ne.s32.totalorder %s16_s10, %s77_s13  ;;  %p83_p2 = scmp.lt.s32.totalorder %s77_s13, %s77_s13 }
   0x6   :  { %p84_p3 = por %p83_p2, %p82_p1 }
   0x8   :  { %p85_p4 = pnand %p84_p3, %p78_p0 }
   0xa   :  { %88 = shalt.err (!%p85_p4)
}
   0xb   :  { %18 = dma.hbm_to_vmem [thread:$0]  %s139_s0, 256, %s16_s10, [#allocation4]  }
   0xc   :  { %s97_s16 = scalar_lea.vmem %s26_s12, 256  ;;  %p102_p6 = scmp.lt.s32.totalorder %s26_s12, %s26_s12 }
   0xd   :  { %p98_p5 = scmp.ne.s32.totalorder %s26_s12, %s97_s16  ;;  %p103_p7 = scmp.lt.s32.totalorder %s97_s16, %s97_s16 }
   0xf   :  { %p104_p8 = por %p103_p7, %p102_p6 }
  0x11   :  { %p105_p9 = pnand %p104_p8, %p98_p5 }
  0x13   :  { %108 = shalt.err (!%p105_p9)
}
  0x14   :  { %28 = dma.hbm_to_vmem [thread:$0]  %s140_s1, 256, %s26_s12, [#allocation6]  }
  0x15   :  { %109 = dma.done.wait [#allocation4], 256  }
  0x16   :  { %110 = vsyncadd [#allocation4], 4294967040 }
  0x17   :  { %111 = dma.done.wait [#allocation6], 256  }
  0x18   :  { %112 = vsyncadd [#allocation6], 4294967040  ;;  %v40_v0 = vld [vmem:[#allocation3] sm:$0xff]  ;;  %v41_v1 = vld [vmem:[#allocation3 + $0x8] sm:$0xff]  ;;  %vm59_vm0 = vcmask 7168  }
  0x19   :  { %v42_v2 = vld [vmem:[#allocation5] sm:$0xff]  ;;  %v43_v3 = vld [vmem:[#allocation5 + $0x8] sm:$0xff] }
  0x1a   :  { %v44_v4 = vsub.f32 %v40_v0, %v42_v2  ;;  %v45_v5 = vsub.f32 %v41_v1, %v43_v3 }
  0x1c   :  { %v46_v6 = vmul.f32 %v44_v4, %v44_v4  ;;  %v47_v7 = vmul.f32 %v45_v5, %v45_v5 }
  0x1e   :  { %v48_v8 = vadd.f32 %v47_v7, %v46_v6 }
  0x20   :  { %56 = vadd.xlane.f32.xlu0 %v48_v8 }
  0xa9   :  { %v57_v9 = vpop.xlane.xlu0 %56 }
  0xaa   :  { %v58_v10 = vmul.f32 0.00390625, %v57_v9 }
  0xac   :  { %60 = vst.msk [vmem:[%s141_s2] sm:$0xff] %vm59_vm0, %v58_v10 }
  0xad   :  { %65 = vsyncpa [#allocation4], 1 }
  0xae   :  { %66 = vsyncpa [#allocation6], 1 }

</bundles_post_ra>
